<compile_context>
chip_gen: v7x
topology: tpu7x:2x2x1
jax: 0.10.0
libtpu: 0.0.40
codegen_flags: <defaults>
</compile_context>

<pallas_src>
import jax
import jax.numpy as jnp
import numpy as np
from jax import lax
from jax.experimental import pallas as pl
from jax.experimental.pallas import tpu as pltpu


MIN_GRID_STEPS = 4  # >= 2 steps per core so v7x's 2 TCs both get work + pipelining


def fitting_kernel(x_ref, w0t_ref, b0_ref, w1t_ref, b1_ref, dt0_ref,
                   w2t_ref, b2_ref, dt1_ref, w3_ref, b3_ref, o_ref):
    # x tile: [tm, D_in] f32 straight from HBM; cast to bf16 only at the MXU
    # input (accumulation is f32).  All activations live in transposed [H, tm]
    # layout so tanh / bias / resnet math is fully lane-dense despite H=32.
    x_bf = x_ref[...].astype(jnp.bfloat16)

    # layer 1: h_t[H, tm] = W0^T @ x^T  (transposed-RHS / q@k.T style dot)
    h = lax.dot_general(w0t_ref[...], x_bf, (((1,), (1,)), ((), ())),
                        preferred_element_type=jnp.float32)
    xt = jnp.tanh(h + b0_ref[...])                       # [H, tm] f32

    # layer 2: dense + tanh + resnet_dt   ([H,H] @ [H,tm] plain matmul, bf16 MXU)
    h = jnp.dot(w1t_ref[...], xt.astype(jnp.bfloat16),
                preferred_element_type=jnp.float32)
    h = jnp.tanh(h + b1_ref[...])
    xt = h * dt0_ref[...] + xt

    # layer 3: dense + tanh + resnet_dt
    h = jnp.dot(w2t_ref[...], xt.astype(jnp.bfloat16),
                preferred_element_type=jnp.float32)
    h = jnp.tanh(h + b2_ref[...])
    xt = h * dt1_ref[...] + xt

    # energy head (output dim 1), emitted lane-dense: [1,H] @ [H,tm] -> [1,tm]
    out = jnp.dot(w3_ref[...], xt,
                  preferred_element_type=jnp.float32) + b3_ref[...]
    o_ref[...] = out.astype(o_ref.dtype)


def _round_up(a, b):
    return ((a + b - 1) // b) * b


def fitting_net_forward(x, params, *, tm=4096):
    """x: [M, D_in] float32 -> [M, 1] float32."""
    M, D_in = x.shape
    w0, b0, w1, b1, dt0, w2, b2, dt1, w3, b3 = params
    H = w0.shape[1]

    # Row tiling: cap tm so there are >= MIN_GRID_STEPS grid steps (v7x has two
    # TCs sharing the "parallel" axis) while keeping 128-lane alignment.
    # Ragged M is handled by Pallas' partial last block (masked output write);
    # no host-side jnp.pad / astype streams x through HBM again.
    tm = max(128, min(_round_up(tm, 128),
                      _round_up(pl.cdiv(M, MIN_GRID_STEPS), 128)))
    num_tiles = pl.cdiv(M, tm)

    # One-time, tiny host-side param reshapes for the transposed [H, tm] layout.
    f32 = jnp.float32
    w0t = jnp.transpose(w0).astype(jnp.bfloat16)     # [H, D_in] bf16 MXU weight
    w1t = jnp.transpose(w1).astype(jnp.bfloat16)     # [H, H]
    w2t = jnp.transpose(w2).astype(jnp.bfloat16)     # [H, H]
    b0c = jnp.reshape(b0, (H, 1)).astype(f32)        # (H,1): broadcast over lanes
    b1c = jnp.reshape(b1, (H, 1)).astype(f32)
    b2c = jnp.reshape(b2, (H, 1)).astype(f32)
    dt0c = jnp.reshape(dt0, (H, 1)).astype(f32)
    dt1c = jnp.reshape(dt1, (H, 1)).astype(f32)
    w3r = jnp.reshape(w3, (1, H)).astype(f32)        # lane-dense head weight (f32)
    b3c = jnp.reshape(b3, (1, 1)).astype(f32)

    small = [w0t, b0c, w1t, b1c, dt0c, w2t, b2c, dt1c, w3r, b3c]
    full = lambda a: pl.BlockSpec(a.shape, lambda i: (0, 0))   # VMEM-resident params

    param_bytes = int(sum(int(p.size) * p.dtype.itemsize for p in small))
    cost = pl.CostEstimate(
        flops=2 * M * (D_in * H + 2 * H * H + H),
        transcendentals=3 * M * H,
        bytes_accessed=M * D_in * 4 + M * 4 + param_bytes,
    )

    out = pl.pallas_call(
        fitting_kernel,
        out_shape=jax.ShapeDtypeStruct((1, M), jnp.float32),
        grid_spec=pltpu.PrefetchScalarGridSpec(
            num_scalar_prefetch=0,
            grid=(num_tiles,),
            in_specs=[pl.BlockSpec((tm, D_in), lambda i: (i, 0))]   # x row tile
                     + [full(p) for p in small],
            out_specs=pl.BlockSpec((1, tm), lambda i: (0, i)),      # lane-dense row
        ),
        compiler_params=pltpu.CompilerParams(
            dimension_semantics=("parallel",)),
        cost_estimate=cost,
    )(x, *small)

    # NOTE: output writes use 1 of 8 sublanes; output is only 4 B/row vs
    # ~256 B/row of input, so this is not a first-order cost (per review).
    return out[0, :].reshape(M, 1)


def init_params(key, input_dim, hidden, out_dim, ener_shift):
    """Deterministic init mirroring the PyTorch __init__ shapes/distributions."""
    network_size = [input_dim, hidden, hidden, hidden, out_dim]
    keys = jax.random.split(key, 16)
    ki = iter(keys)
    params = []
    # hidden layers 1..3
    for i in range(1, 4):
        fan = 1.0 / np.sqrt(network_size[i - 1] + network_size[i])
        w = fan * jax.random.normal(next(ki), (network_size[i - 1], network_size[i]),
                                    dtype=jnp.float32)
        b = jax.random.normal(next(ki), (1, network_size[i]), dtype=jnp.float32)
        params += [w, b]
        if i > 1:  # resnet_dt for layers 2..3
            dt = 0.1 + 0.001 * jax.random.normal(next(ki), (1, network_size[i]),
                                                 dtype=jnp.float32)
            params.append(dt)
    # final linear layer
    i = 4
    fan = 1.0 / np.sqrt(network_size[i - 1] + network_size[i])
    w = fan * jax.random.normal(next(ki), (network_size[i - 1], network_size[i]),
                                dtype=jnp.float32)
    b = ener_shift + jax.random.normal(next(ki), (1, network_size[i]),
                                       dtype=jnp.float32)
    params += [w, b]
    return tuple(params)


def fitting_net_reference(x, params):
    w0, b0, w1, b1, dt0, w2, b2, dt1, w3, b3 = params
    h = jnp.tanh(x @ w0 + b0); x = h
    h = jnp.tanh(x @ w1 + b1); x = h * dt0 + x
    h = jnp.tanh(x @ w2 + b2); x = h * dt1 + x
    return x @ w3 + b3


if __name__ == "__main__":
    key = jax.random.PRNGKey(0)
    k_param, k_x, k_x2 = jax.random.split(key, 3)

    M, D_in, H = 256, 64, 32          # rows (batch*natoms), descriptor dim, hidden width
    ener_shift = -3.37

    params = init_params(k_param, D_in, H, 1, ener_shift)

    # Test 1: aligned row count (tile capped to 128 -> 2 grid steps).
    # bf16 MXU inputs introduce ~1e-3 relative error vs the f32 reference.
    x = jax.random.normal(k_x, (M, D_in), dtype=jnp.float32)
    out = jax.block_until_ready(fitting_net_forward(x, params))
    ref = fitting_net_reference(x, params)
    np.testing.assert_allclose(np.asarray(out), np.asarray(ref), rtol=2e-2, atol=2e-2)
    assert out.shape == (M, 1)

    # Test 2: ragged row count + multi-step grid (exercises partial last block).
    M2 = 333
    x2 = jax.random.normal(k_x2, (M2, D_in), dtype=jnp.float32)
    out2 = jax.block_until_ready(fitting_net_forward(x2, params))
    ref2 = fitting_net_reference(x2, params)
    np.testing.assert_allclose(np.asarray(out2), np.asarray(ref2), rtol=2e-2, atol=2e-2)
    assert out2.shape == (M2, 1)

    print("KERNEL_OK")
</pallas_src>

<mosaic_0001>
module attributes {stable_mosaic.version = 11 : i64} {
  func.func @fitting_kernel(%arg0: i32, %arg1: memref<128x64xf32, #tpu.memory_space<vmem>>, %arg2: memref<32x64xbf16, #tpu.memory_space<vmem>>, %arg3: memref<32x1xf32, #tpu.memory_space<vmem>>, %arg4: memref<32x32xbf16, #tpu.memory_space<vmem>>, %arg5: memref<32x1xf32, #tpu.memory_space<vmem>>, %arg6: memref<32x1xf32, #tpu.memory_space<vmem>>, %arg7: memref<32x32xbf16, #tpu.memory_space<vmem>>, %arg8: memref<32x1xf32, #tpu.memory_space<vmem>>, %arg9: memref<32x1xf32, #tpu.memory_space<vmem>>, %arg10: memref<1x32xf32, #tpu.memory_space<vmem>>, %arg11: memref<1x1xf32, #tpu.memory_space<vmem>>, %arg12: memref<1x128xf32, #tpu.memory_space<vmem>>) attributes {dimension_semantics = [#tpu.dimension_semantics<parallel>], iteration_bounds = array<i64: 2>, scalar_prefetch = 0 : i64, scratch_operands = 0 : i64, tpu.core_type = #tpu.core_type<tc>, window_params = [{transform_indices = @transform_0, window_bounds = array<i64: 128, 64>}, {pipeline_mode = #tpu.pipeline_mode<synchronous>, transform_indices = @transform_1, window_bounds = array<i64: 32, 64>}, {pipeline_mode = #tpu.pipeline_mode<synchronous>, transform_indices = @transform_2, window_bounds = array<i64: 32, 1>}, {pipeline_mode = #tpu.pipeline_mode<synchronous>, transform_indices = @transform_3, window_bounds = array<i64: 32, 32>}, {pipeline_mode = #tpu.pipeline_mode<synchronous>, transform_indices = @transform_4, window_bounds = array<i64: 32, 1>}, {pipeline_mode = #tpu.pipeline_mode<synchronous>, transform_indices = @transform_5, window_bounds = array<i64: 32, 1>}, {pipeline_mode = #tpu.pipeline_mode<synchronous>, transform_indices = @transform_6, window_bounds = array<i64: 32, 32>}, {pipeline_mode = #tpu.pipeline_mode<synchronous>, transform_indices = @transform_7, window_bounds = array<i64: 32, 1>}, {pipeline_mode = #tpu.pipeline_mode<synchronous>, transform_indices = @transform_8, window_bounds = array<i64: 32, 1>}, {pipeline_mode = #tpu.pipeline_mode<synchronous>, transform_indices = @transform_9, window_bounds = array<i64: 1, 32>}, {pipeline_mode = #tpu.pipeline_mode<synchronous>, transform_indices = @transform_10, window_bounds = array<i64: 1, 1>}, {transform_indices = @transform_11, window_bounds = array<i64: 1, 128>}]} {
    %c0 = arith.constant 0 : index
    %c0_0 = arith.constant 0 : index
    %0 = vector.load %arg1[%c0, %c0_0] : memref<128x64xf32, #tpu.memory_space<vmem>>, vector<128x64xf32>
    %1 = arith.truncf %0 : vector<128x64xf32> to vector<128x64xbf16>
    %c0_1 = arith.constant 0 : index
    %c0_2 = arith.constant 0 : index
    %2 = vector.load %arg2[%c0_1, %c0_2] : memref<32x64xbf16, #tpu.memory_space<vmem>>, vector<32x64xbf16>
    %cst = arith.constant dense<0.000000e+00> : vector<32x128xf32>
    %3 = tpu.matmul %2, %1, %cst {dimension_numbers = #tpu.dot_dimension_numbers<[1], [1], [0], [0], [0, 0, 1, 0], [], []>} : vector<32x64xbf16>, vector<128x64xbf16>, vector<32x128xf32> -> vector<32x128xf32>
    %c0_3 = arith.constant 0 : index
    %c0_4 = arith.constant 0 : index
    %4 = vector.load %arg3[%c0_3, %c0_4] : memref<32x1xf32, #tpu.memory_space<vmem>>, vector<32x1xf32>
    %5 = vector.broadcast %4 : vector<32x1xf32> to vector<32x128xf32>
    %6 = arith.addf %3, %5 : vector<32x128xf32>
    %7 = math.tanh %6 : vector<32x128xf32>
    %c0_5 = arith.constant 0 : index
    %c0_6 = arith.constant 0 : index
    %8 = vector.load %arg4[%c0_5, %c0_6] : memref<32x32xbf16, #tpu.memory_space<vmem>>, vector<32x32xbf16>
    %9 = arith.truncf %7 : vector<32x128xf32> to vector<32x128xbf16>
    %cst_7 = arith.constant dense<0.000000e+00> : vector<32x128xf32>
    %10 = tpu.matmul %8, %9, %cst_7 {dimension_numbers = #tpu.dot_dimension_numbers<[1], [0], [0], [1], [0, 0, 1, 1], [], []>} : vector<32x32xbf16>, vector<32x128xbf16>, vector<32x128xf32> -> vector<32x128xf32>
    %c0_8 = arith.constant 0 : index
    %c0_9 = arith.constant 0 : index
    %11 = vector.load %arg5[%c0_8, %c0_9] : memref<32x1xf32, #tpu.memory_space<vmem>>, vector<32x1xf32>
    %12 = vector.broadcast %11 : vector<32x1xf32> to vector<32x128xf32>
    %13 = arith.addf %10, %12 : vector<32x128xf32>
    %14 = math.tanh %13 : vector<32x128xf32>
    %c0_10 = arith.constant 0 : index
    %c0_11 = arith.constant 0 : index
    %15 = vector.load %arg6[%c0_10, %c0_11] : memref<32x1xf32, #tpu.memory_space<vmem>>, vector<32x1xf32>
    %16 = vector.broadcast %15 : vector<32x1xf32> to vector<32x128xf32>
    %17 = arith.mulf %14, %16 : vector<32x128xf32>
    %18 = arith.addf %17, %7 : vector<32x128xf32>
    %c0_12 = arith.constant 0 : index
    %c0_13 = arith.constant 0 : index
    %19 = vector.load %arg7[%c0_12, %c0_13] : memref<32x32xbf16, #tpu.memory_space<vmem>>, vector<32x32xbf16>
    %20 = arith.truncf %18 : vector<32x128xf32> to vector<32x128xbf16>
    %cst_14 = arith.constant dense<0.000000e+00> : vector<32x128xf32>
    %21 = tpu.matmul %19, %20, %cst_14 {dimension_numbers = #tpu.dot_dimension_numbers<[1], [0], [0], [1], [0, 0, 1, 1], [], []>} : vector<32x32xbf16>, vector<32x128xbf16>, vector<32x128xf32> -> vector<32x128xf32>
    %c0_15 = arith.constant 0 : index
    %c0_16 = arith.constant 0 : index
    %22 = vector.load %arg8[%c0_15, %c0_16] : memref<32x1xf32, #tpu.memory_space<vmem>>, vector<32x1xf32>
    %23 = vector.broadcast %22 : vector<32x1xf32> to vector<32x128xf32>
    %24 = arith.addf %21, %23 : vector<32x128xf32>
    %25 = math.tanh %24 : vector<32x128xf32>
    %c0_17 = arith.constant 0 : index
    %c0_18 = arith.constant 0 : index
    %26 = vector.load %arg9[%c0_17, %c0_18] : memref<32x1xf32, #tpu.memory_space<vmem>>, vector<32x1xf32>
    %27 = vector.broadcast %26 : vector<32x1xf32> to vector<32x128xf32>
    %28 = arith.mulf %25, %27 : vector<32x128xf32>
    %29 = arith.addf %28, %18 : vector<32x128xf32>
    %c0_19 = arith.constant 0 : index
    %c0_20 = arith.constant 0 : index
    %30 = vector.load %arg10[%c0_19, %c0_20] : memref<1x32xf32, #tpu.memory_space<vmem>>, vector<1x32xf32>
    %cst_21 = arith.constant dense<0.000000e+00> : vector<1x128xf32>
    %31 = tpu.matmul %30, %29, %cst_21 {dimension_numbers = #tpu.dot_dimension_numbers<[1], [0], [0], [1], [0, 0, 1, 1], [], []>} : vector<1x32xf32>, vector<32x128xf32>, vector<1x128xf32> -> vector<1x128xf32>
    %c0_22 = arith.constant 0 : index
    %c0_23 = arith.constant 0 : index
    %32 = vector.load %arg11[%c0_22, %c0_23] : memref<1x1xf32, #tpu.memory_space<vmem>>, vector<1x1xf32>
    %33 = vector.broadcast %32 : vector<1x1xf32> to vector<1x128xf32>
    %34 = arith.addf %31, %33 : vector<1x128xf32>
    %c0_24 = arith.constant 0 : index
    %c0_25 = arith.constant 0 : index
    %35 = vector.load %arg12[%c0_24, %c0_25] : memref<1x128xf32, #tpu.memory_space<vmem>>, vector<1x128xf32>
    tpu.vector_store %arg12[%c0_24, %c0_25], %34 {strides = array<i32>} : memref<1x128xf32, #tpu.memory_space<vmem>>, vector<1x128xf32>,
    return
  }
  func.func @transform_0(%arg0: i32) -> (i32, i32) {
    %c0_i32 = arith.constant 0 : i32
    %c0_i32_0 = arith.constant 0 : i32
    return %arg0, %c0_i32 : i32, i32
  }
  func.func @transform_1(%arg0: i32) -> (i32, i32) {
    %c0_i32 = arith.constant 0 : i32
    %c0_i32_0 = arith.constant 0 : i32
    %c0_i32_1 = arith.constant 0 : i32
    return %c0_i32, %c0_i32_0 : i32, i32
  }
  func.func @transform_2(%arg0: i32) -> (i32, i32) {
    %c0_i32 = arith.constant 0 : i32
    %c0_i32_0 = arith.constant 0 : i32
    %c0_i32_1 = arith.constant 0 : i32
    return %c0_i32, %c0_i32_0 : i32, i32
  }
  func.func @transform_3(%arg0: i32) -> (i32, i32) {
    %c0_i32 = arith.constant 0 : i32
    %c0_i32_0 = arith.constant 0 : i32
    %c0_i32_1 = arith.constant 0 : i32
    return %c0_i32, %c0_i32_0 : i32, i32
  }
  func.func @transform_4(%arg0: i32) -> (i32, i32) {
    %c0_i32 = arith.constant 0 : i32
    %c0_i32_0 = arith.constant 0 : i32
    %c0_i32_1 = arith.constant 0 : i32
    return %c0_i32, %c0_i32_0 : i32, i32
  }
  func.func @transform_5(%arg0: i32) -> (i32, i32) {
    %c0_i32 = arith.constant 0 : i32
    %c0_i32_0 = arith.constant 0 : i32
    %c0_i32_1 = arith.constant 0 : i32
    return %c0_i32, %c0_i32_0 : i32, i32
  }
  func.func @transform_6(%arg0: i32) -> (i32, i32) {
    %c0_i32 = arith.constant 0 : i32
    %c0_i32_0 = arith.constant 0 : i32
    %c0_i32_1 = arith.constant 0 : i32
    return %c0_i32, %c0_i32_0 : i32, i32
  }
  func.func @transform_7(%arg0: i32) -> (i32, i32) {
    %c0_i32 = arith.constant 0 : i32
    %c0_i32_0 = arith.constant 0 : i32
    %c0_i32_1 = arith.constant 0 : i32
    return %c0_i32, %c0_i32_0 : i32, i32
  }
  func.func @transform_8(%arg0: i32) -> (i32, i32) {
    %c0_i32 = arith.constant 0 : i32
    %c0_i32_0 = arith.constant 0 : i32
    %c0_i32_1 = arith.constant 0 : i32
    return %c0_i32, %c0_i32_0 : i32, i32
  }
  func.func @transform_9(%arg0: i32) -> (i32, i32) {
    %c0_i32 = arith.constant 0 : i32
    %c0_i32_0 = arith.constant 0 : i32
    %c0_i32_1 = arith.constant 0 : i32
    return %c0_i32, %c0_i32_0 : i32, i32
  }
  func.func @transform_10(%arg0: i32) -> (i32, i32) {
    %c0_i32 = arith.constant 0 : i32
    %c0_i32_0 = arith.constant 0 : i32
    %c0_i32_1 = arith.constant 0 : i32
    return %c0_i32, %c0_i32_0 : i32, i32
  }
  func.func @transform_11(%arg0: i32) -> (i32, i32) {
    %c0_i32 = arith.constant 0 : i32
    %c0_i32_0 = arith.constant 0 : i32
    return %c0_i32, %arg0 : i32, i32
  }
}

</mosaic_0001>

<bundles_post_ra>
// kernel: tpu_custom_call.1
= control target key start
LH: loop header
LB: loop body
LE: loop exit
PB: predicated region body
PF: predicated region fallthrough
CT: control target
= control target key end

     0   :  { %s1485_s0 = inlined_call_operand.vmem [shape: f32[256,64], index: 0, kind: input, shape index: {}]   ;;  %s1486_s1 = inlined_call_operand.vmem [shape: bf16[32,64], index: 1, kind: input, shape index: {}]   ;;  %s1487_s2 = inlined_call_operand.vmem [shape: f32[32,1], index: 2, kind: input, shape index: {}]   ;;  %s1488_s3 = inlined_call_operand.vmem [shape: bf16[32,32], index: 3, kind: input, shape index: {}]   ;;  %s1489_s4 = inlined_call_operand.vmem [shape: f32[32,1], index: 4, kind: input, shape index: {}]   ;;  %s1490_s5 = inlined_call_operand.vmem [shape: f32[32,1], index: 5, kind: input, shape index: {}]   ;;  %s1491_s6 = inlined_call_operand.vmem [shape: bf16[32,32], index: 6, kind: input, shape index: {}]   ;;  %s1492_s7 = inlined_call_operand.vmem [shape: f32[32,1], index: 7, kind: input, shape index: {}]   ;;  %s1493_s8 = inlined_call_operand.vmem [shape: f32[32,1], index: 8, kind: input, shape index: {}]   ;;  %s1494_s9 = inlined_call_operand.vmem [shape: f32[1,32], index: 9, kind: input, shape index: {}]   ;;  %s1495_s10 = inlined_call_operand.<no memory space> [shape: f32[1,1], index: 10, kind: input, shape index: {}]   ;;  %s1496_s11 = inlined_call_operand.hbm [shape: f32[1,256], index: 11, kind: output, shape index: {}]  }
   0x1   :  { %v16_v0 = vstv %s1495_s10 }
   0x2   :  { %17 = vst [vmem:[#allocation2] sm:$0x1] %v16_v0 }
   0x3   :  { %18 = vsyncpa [#allocation4], 0 }
   0x4   :  { %20 = vsyncpa [#allocation4 + $0x1], 0  ;;  %s1264_s19 = smov 0   ;;  %s1266_s20 = smov 0  }
   0x5   :  { %s1268_s21 = smov 0   ;;  %s1270_s22 = smov 0  }
   0x6 LB: > { %s950_s10 = sadd.s32 4294967295, %s1194_s22   ;;  %s951_s23 = sadd.s32 4294967294, %s1194_s22   ;;  %s1194_s22 = sphi %s1270_s22, %s1502_s22   ;;  %s1190_s21 = sphi %s1268_s21, %s1501_s21   ;;  %s1186_s20 = sphi %s1266_s20, %s1500_s20   ;;  %s1182_s19 = sphi %s1264_s19, %s1499_s19  }
   0x7   : > { %s1287_s24 = sadd.s32 1, %s1194_s22   ;;  %s269_s25 = sadd.s32 1, %s1190_s21 }
   0x8   : > { %s266_s26 = ssub.s32 %s1194_s22, %s1287_s24  ;;  %p279_p0 = scmp.ne.s32.totalorder %s1190_s21, %s1186_s20 }
   0x9   : > { %p267_p1 = scmp.eq.s32.totalorder %s266_s26, 0  ;;  %p280_p2 = scmp.eq.s32.totalorder %s950_s10, 1 }
   0xa   : > { %p285_p3 = scmp.ne.s32.totalorder %s1186_s20, %s1182_s19  ;;  %p286_p4 = scmp.eq.s32.totalorder %s951_s23, 1 }
   0xb   : > { %s1297_s27 = scalar_select %p267_p1, %s1190_s21, %s269_s25  }
   0xc   : > { %p1299_p5 = por %p280_p2, %p279_p0  ;;  %p1303_p6 = por %p286_p4, %p285_p3 }
   0xd   : > { %p954_p7 = scmp.ge.s32.totalorder %s1194_s22, 1  ;;  %p343_p8 = scmp.lt.s32.totalorder %s1194_s22, 3 }
   0xf   : > { %p344_p9 = pnand %p954_p7, %p343_p8 }
  0x10   : > { %s1309_s30 = sshll.u32 (!%p344_p9), %s950_s10, 4  ;;  %v1102_v1 = vld [vmem:[%s1486_s1] sm:$0xff] (!%p344_p9)   ;;  %vm451_vm0 = vcmask (!%p344_p9), 523264   ;;  %v1196_v3 = vmov (!%p344_p9), 0   ;;  %v419_v4 = vld [vmem:[%s1487_s2 + $0x10] sm:$0xff] (!%p344_p9)  ;;  %v418_v5 = vld [vmem:[%s1487_s2 + $0x8] sm:$0xff] (!%p344_p9) }
  0x11   : > { %347 = sbr.rel (%p344_p9) target bundleno = 1044 (0x414), region = 64  ;;  %p383_p10 = scmp.lt.s32.totalorder (!%p344_p9), %s1309_s30, 31  ;;  %v417_v2 = vld [vmem:[%s1487_s2] sm:$0xff] (!%p344_p9)  ;;  %1012 = vmatprep.mubr.msk.bf16.mxu0 (!%p344_p9), %vm451_vm0, %v1102_v1  ;;  %1100 = vset.pattern.permute.xlu0 (!%p344_p9), %v1196_v3  ;;  %v420_v6 = vld [vmem:[%s1487_s2 + $0x18] sm:$0xff] (!%p344_p9)  ;;  %v542_v15 = vld [vmem:[%s1489_s4 + $0x8] sm:$0xff] (!%p344_p9)  ;;  %vm575_vm1 = vcmask (!%p344_p9), 261120  }
  0x12   : > { %423 = vperm.xlu0 (!%p344_p9), %1100, %v417_v2   ;;  %1101 = vset.pattern.permute.xlu1 (!%p344_p9), %v1196_v3  ;;  %v541_v13 = vld [vmem:[%s1489_s4] sm:$0xff] (!%p344_p9)  ;;  %v543_v18 = vld [vmem:[%s1489_s4 + $0x10] sm:$0xff] (!%p344_p9)  ;;  %v544_v19 = vld [vmem:[%s1489_s4 + $0x18] sm:$0xff] (!%p344_p9)  ;;  %vm1198_vm2 = vmmov (!%p344_p9), 0   ;;  %s1443_s12 = scalar_lea.hbm (!%p344_p9), %s1496_s11, %s1309_s30 }
  0x13   : > { %433 = vperm.xlu1 (!%p344_p9), %1101, %v419_v4   ;;  %v635_v22 = vld [vmem:[%s1490_s5] sm:$0xff] (!%p344_p9)  ;;  %v636_v23 = vld [vmem:[%s1490_s5 + $0x8] sm:$0xff] (!%p344_p9)  ;;  %v637_v26 = vld [vmem:[%s1490_s5 + $0x10] sm:$0xff] (!%p344_p9) }
  0x14   : > { %v638_v27 = vld [vmem:[%s1490_s5 + $0x18] sm:$0xff] (!%p344_p9)  ;;  %v673_v30 = vld [vmem:[%s1492_s7] sm:$0xff] (!%p344_p9)  ;;  %v674_v31 = vld [vmem:[%s1492_s7 + $0x8] sm:$0xff] (!%p344_p9) }
  0x15   : > { %v675_v34 = vld [vmem:[%s1492_s7 + $0x10] sm:$0xff] (!%p344_p9)  ;;  %v676_v35 = vld [vmem:[%s1492_s7 + $0x18] sm:$0xff] (!%p344_p9)  ;;  %v766_v38 = vld [vmem:[%s1493_s8] sm:$0xff] (!%p344_p9) }
  0x16   : > { %428 = vperm.xlu0 (!%p344_p9), %1100, %v418_v5   ;;  %v767_v39 = vld [vmem:[%s1493_s8 + $0x8] sm:$0xff] (!%p344_p9)  ;;  %v768_v42 = vld [vmem:[%s1493_s8 + $0x10] sm:$0xff] (!%p344_p9)  ;;  %v769_v43 = vld [vmem:[%s1493_s8 + $0x18] sm:$0xff] (!%p344_p9) }
  0x17   : > { %438 = vperm.xlu1 (!%p344_p9), %1101, %v420_v6   ;;  %v799_v46 = vld [vmem:[#allocation2] sm:$0x1] (!%p344_p9)  ;;  %v1103_v56 = vld [vmem:[%s1486_s1 + $0x8] sm:$0xff] (!%p344_p9)  }
  0x18   : > { %s384_s16 = scalar_select %p383_p10, %s1309_s30, 31  ;;  %v1104_v57 = vld [vmem:[%s1488_s3] sm:$0xff]  }
  0x19   : > { %1020 = vmatprep.mubr.msk.bf16.mxu1 %vm575_vm1, %v1104_v57 }
  0x1a   : > { %s956_s10 = sshll.u32 %s384_s16, 3  ;;  %547 = vperm.xlu0 %1100, %v541_v13   ;;  %v1106_v13 = vld [vmem:[%s1491_s6] sm:$0xff]   ;;  %s1200_s16 = smov [#allocation3]  }
  0x1b   : > { %s1329_s13 = scalar_lea.vmem %s1485_s0, %s956_s10  ;;  %552 = vperm.xlu1 %1101, %v542_v15   ;;  %s380_s10 = sand.u32 1, %s1186_s20  }
  0x1c   : > { %v389_v7 = vld [vmem:[%s1329_s13] sm:$0xff]  ;;  %v390_v8 = vld [vmem:[%s1329_s13 + $0x8] sm:$0xff]  ;;  %v391_v9 = vld [vmem:[%s1329_s13 + $0x10] sm:$0xff]  ;;  %s381_s23 = scalar_lea.vmem [#allocation3], %s380_s10  ;;  %s884_s14 = scalar_lea.sflag [#allocation4], %s380_s10 }
  0x1d   : > { %v405_v10 = vpack.c.bf16 %v390_v8, %v389_v7  ;;  %v392_v11 = vld [vmem:[%s1329_s13 + $0x18] sm:$0xff]  ;;  %v393_v16 = vld [vmem:[%s1329_s13 + $0x20] sm:$0xff]  ;;  %v394_v17 = vld [vmem:[%s1329_s13 + $0x28] sm:$0xff]  ;;  %s896_s25 = sshll.u32 %s381_s23, 4  ;;  %s1136_s17 = sshll.u32 %s1200_s16, 4  ;;  %s1445_s25 = int_to_ptr.vmem [resolvable:$true] %s896_s25  ;;  %s1137_s17 = int_to_ptr.vmem [resolvable:$false] %s1136_s17 }
  0x1e   : > { %v406_v12 = vpack.c.bf16 %v392_v11, %v391_v9  ;;  %v407_v21 = vpack.c.bf16 %v394_v17, %v393_v16  ;;  %557 = vperm.xlu0 %1100, %v543_v18   ;;  %v395_v24 = vld [vmem:[%s1329_s13 + $0x30] sm:$0xff]  ;;  %v396_v25 = vld [vmem:[%s1329_s13 + $0x38] sm:$0xff]  ;;  %v397_v32 = vld [vmem:[%s1329_s13 + $0x40] sm:$0xff]  ;;  %s1132_s15 = scalar_lea.vmem %s1445_s25, 16  ;;  %s1138_s18 = scalar_lea.vmem %s1137_s17, 32 }
  0x1f   : > { %1049 = vmatprep.subr.msk.bf16.mxu0 %vm451_vm0, %v405_v10  ;;  %v459_v14 = vsel %vm451_vm0, %v405_v10, 0  ;;  %562 = vperm.xlu1 %1101, %v544_v19   ;;  %v408_v29 = vpack.c.bf16 %v396_v25, %v395_v24  ;;  %v398_v33 = vld [vmem:[%s1329_s13 + $0x48] sm:$0xff]  ;;  %v399_v40 = vld [vmem:[%s1329_s13 + $0x50] sm:$0xff]  ;;  %v400_v41 = vld [vmem:[%s1329_s13 + $0x58] sm:$0xff]  ;;  %p1133_p11 = scmp.ne.s32.totalorder %s1445_s25, %s1132_s15  ;;  %p1139_p0 = scmp.lt.s32.totalorder %s1445_s25, %s1137_s17 }
  0x20   : > { %997 = vmatpush3.bf16.xpose.msra.mxu0 %v459_v14  ;;  %v462_v20 = vsel %vm451_vm0, %v406_v12, 0  ;;  %v465_v28 = vsel %vm451_vm0, %v407_v21, 0  ;;  %v409_v37 = vpack.c.bf16 %v398_v33, %v397_v32  ;;  %v410_v45 = vpack.c.bf16 %v400_v41, %v399_v40  ;;  %v401_v47 = vld [vmem:[%s1329_s13 + $0x60] sm:$0xff]  ;;  %v402_v48 = vld [vmem:[%s1329_s13 + $0x68] sm:$0xff]  ;;  %v403_v51 = vld [vmem:[%s1329_s13 + $0x70] sm:$0xff]  ;;  %p1140_p1 = scmp.lt.s32.totalorder %s1138_s18, %s1132_s15 }
  0x21   : > { %1050 = vmatprep.subr.msk.bf16.mxu0 %vm451_vm0, %v406_v12  ;;  %v468_v36 = vsel %vm451_vm0, %v408_v29, 0  ;;  %v411_v50 = vpack.c.bf16 %v402_v48, %v401_v47  ;;  %v404_v52 = vld [vmem:[%s1329_s13 + $0x78] sm:$0xff]  ;;  %v1105_v12 = vld [vmem:[%s1488_s3 + $0x8] sm:$0xff]   ;;  %p1134_p12 = pnand %p1133_p11, %p1299_p5 }
  0x22   : > { %641 = vperm.xlu0 %1100, %v635_v22   ;;  %v471_v44 = vsel %vm451_vm0, %v409_v37, 0  ;;  %v474_v49 = vsel %vm451_vm0, %v410_v45, 0  ;;  %v412_v54 = vpack.c.bf16 %v404_v52, %v403_v51  ;;  %p1141_p2 = por %p1140_p1, %p1139_p0 }
  0x23   : > { %646 = vperm.xlu1 %1101, %v636_v23   ;;  %v477_v53 = vsel %vm451_vm0, %v411_v50, 0  ;;  %p1135_p13 = pneg %p1134_p12 }
  0x24   : > { %v480_v55 = vsel %vm451_vm0, %v412_v54, 0 }
  0x25   : > { %p1142_p3 = pnand %p1141_p2, %p1135_p13 }
  0x26   : > { %651 = vperm.xlu0 %1100, %v637_v26  }
  0x27   : > { %656 = vperm.xlu1 %1101, %v638_v27  }
  0x28   : > { %999 = vmatpush3.bf16.xpose.msra.mxu0 %v462_v20 }
  0x29   : > { %1051 = vmatprep.subr.msk.bf16.mxu0 %vm451_vm0, %v407_v21 }
  0x2a   : > { %679 = vperm.xlu0 %1100, %v673_v30  }
  0x2b   : > { %684 = vperm.xlu1 %1101, %v674_v31  }
  0x2e   : > { %689 = vperm.xlu0 %1100, %v675_v34  }
  0x2f   : > { %694 = vperm.xlu1 %1101, %v676_v35  }
  0x30   : > { %1001 = vmatpush3.bf16.xpose.msra.mxu0 %v465_v28 }
  0x31   : > { %1052 = vmatprep.subr.msk.bf16.mxu0 %vm451_vm0, %v408_v29 }
  0x32   : > { %772 = vperm.xlu0 %1100, %v766_v38  }
  0x33   : > { %777 = vperm.xlu1 %1101, %v767_v39  }
  0x36   : > { %782 = vperm.xlu0 %1100, %v768_v42  }
  0x37   : > { %787 = vperm.xlu1 %1101, %v769_v43  }
  0x38   : > { %1003 = vmatpush3.bf16.xpose.msra.mxu0 %v468_v36 }
  0x39   : > { %1053 = vmatprep.subr.msk.bf16.mxu0 %vm451_vm0, %v409_v37 }
  0x3a   : > { %802 = vperm.xlu0 %1100, %v799_v46   ;;  %v1199_v46 = vmov 0.0  }
  0x40   : > { %1005 = vmatpush3.bf16.xpose.msra.mxu0 %v471_v44  ;;  %v1107_v44 = vld [vmem:[%s1491_s6 + $0x8] sm:$0xff]  }
  0x41   : > { %1054 = vmatprep.subr.msk.bf16.mxu0 %vm451_vm0, %v410_v45  ;;  %v1197_v45 = vmov 0.0|0.0  }
  0x48   : > { %1007 = vmatpush3.bf16.xpose.msra.mxu0 %v474_v49 }
  0x49   : > { %1055 = vmatprep.subr.msk.bf16.mxu0 %vm451_vm0, %v411_v50 }
  0x50   : > { %1009 = vmatpush3.bf16.xpose.msra.mxu0 %v477_v53 }
  0x51   : > { %1056 = vmatprep.subr.msk.bf16.mxu0 %vm451_vm0, %v412_v54 }
  0x58   : > { %1011 = vmatpush3.bf16.xpose.msra.mxu0 %v480_v55 }
  0x5f   : > { %1013 = vmatmul.mubr.msk.bf16.vlgmr.msra.gmra.mrb[0].mxu0 %vm451_vm0, %v1103_v56 }
  0x91   : > { %v424_v59 = vpop.permute.xlu0 %423 }
  0x92   : > { %v434_v58 = vpop.permute.xlu1 %433 }
  0x95   : > { %v429_v1 = vpop.permute.xlu0 %428 }
  0x96   : > { %v439_v62 = vpop.permute.xlu1 %438 }
  0x99   : > { %v548_v14 = vpop.permute.xlu0 %547 }
  0x9a   : > { %v553_v15 = vpop.permute.xlu1 %552 }
  0x9d   : > { %v558_v16 = vpop.permute.xlu0 %557 }
  0x9e   : > { %v563_v20 = vpop.permute.xlu1 %562 }
  0xa1   : > { %v642_v27 = vpop.permute.xlu0 %641 }
  0xa2   : > { %v647_v26 = vpop.permute.xlu1 %646 }
  0xa5   : > { %v652_v34 = vpop.permute.xlu0 %651 }
  0xa6   : > { %v657_v31 = vpop.permute.xlu1 %656 }
  0xa9   : > { %v680_v47 = vpop.permute.xlu0 %679 }
  0xaa   : > { %v685_v48 = vpop.permute.xlu1 %684 }
  0xad   : > { %v690_v49 = vpop.permute.xlu0 %689 }
  0xae   : > { %v695_v53 = vpop.permute.xlu1 %694 }
 0x132   : > { %v1014_v60 = vpop.f32.mrb[0].mxu0 }
 0x133   : > { %v516_v61 = vpop.f32.mrb[1].mxu0  ;;  %v525_v4 = vadd.f32 %v1014_v60, %v434_v58  ;;  %v778_v60 = vpop.permute.xlu1 %777 }
 0x134   : > { %v517_v63 = vadd.f32 %v516_v61, %v424_v59  ;;  %v1015_v0 = vpop.f32.mrb[2].mxu0  ;;  %v773_v59 = vpop.permute.xlu0 %772 }
 0x135   : > { %v528_v2 = vadd.f32 %v1015_v0, %v439_v62  ;;  %v519_v3 = vpop.f32.mrb[3].mxu0 }
 0x136   : > { %1108 = vtanh.f32 %v517_v63  ;;  %v520_v5 = vadd.f32 %v519_v3, %v429_v1 }
 0x137   : > { %1110 = vtanh.f32 %v528_v2  ;;  %v788_v2 = vpop.permute.xlu1 %787 }
 0x138   : > { %1112 = vtanh.f32 %v520_v5  ;;  %v783_v62 = vpop.permute.xlu0 %782 }
 0x139   : > { %1114 = vtanh.f32 %v525_v4 }
 0x140   : > { %v1109_v6 = vpop.eup %1108 }
 0x141   : > { %v1111_v7 = vpop.eup %1110 }
 0x142   : > { %v1113_v8 = vpop.eup %1112 }
 0x143   : > { %v539_v9 = vpack.c.bf16 %v1113_v8, %v1109_v6  ;;  %v1115_v10 = vpop.eup %1114 }
 0x144   : > { %v540_v11 = vpack.c.bf16 %v1111_v7, %v1115_v10 }
 0x145   : > { %1016 = vmatprep.subr.bf16.mxu1 %v539_v9 }
 0x146   : > { %1017 = vmatpush3.bf16.msra.mxu1 %v539_v9 }
 0x147   : > { %1018 = vmatprep.subr.bf16.mxu1 %v540_v11 }
 0x14a   : > { %1019 = vmatpush3.bf16.msra.mxu1 %v540_v11 }
 0x14d   : > { %1021 = vmatmul.mubr.msk.bf16.vlgmr.msra.gmra.mrb[0].mxu1 %vm575_vm1, %v1105_v12 }
 0x14e   : > { %1028 = vmatprep.mubr.msk.bf16.mxu1 %vm575_vm1, %v1106_v13  ;;  %v798_v13 = vld [vmem:[%s1494_s9] sm:$0x1] }
 0x220   : > { %v1022_v17 = vpop.f32.mrb[0].mxu1 }
 0x221   : > { %v625_v18 = vadd.f32 %v1022_v17, %v558_v16  ;;  %v616_v19 = vpop.f32.mrb[1].mxu1  ;;  %v803_v17 = vpop.permute.xlu0 %802 }
 0x222   : > { %v617_v21 = vadd.f32 %v616_v19, %v548_v14  ;;  %v1023_v22 = vpop.f32.mrb[2].mxu1  ;;  %v805_v14 = vlaneseq }
 0x223   : > { %1116 = vtanh.f32 %v625_v18  ;;  %v628_v23 = vadd.f32 %v1023_v22, %v563_v20  ;;  %v619_v24 = vpop.f32.mrb[3].mxu1 }
 0x224   : > { %1118 = vtanh.f32 %v617_v21  ;;  %v620_v25 = vadd.f32 %v619_v24, %v553_v15  ;;  %v806_v15 = vshrl.u32 %v805_v14, 7 }
 0x225   : > { %1120 = vtanh.f32 %v628_v23 }
 0x226   : > { %1122 = vtanh.f32 %v620_v25  ;;  %v807_v16 = vsub.s32 0, %v806_v15 }
 0x228   : > { %v808_v18 = vrot.slane %v803_v17, %v807_v16 }
 0x22d   : > { %v1117_v28 = vpop.eup %1116 }
 0x22e   : > { %v1119_v29 = vpop.eup %1118  ;;  %v661_v37 = vmul.f32 %v1117_v28, %v652_v34 }
 0x22f   : > { %v1121_v30 = vpop.eup %1120  ;;  %v659_v32 = vmul.f32 %v1119_v29, %v642_v27 }
 0x230   : > { %v1123_v33 = vpop.eup %1122  ;;  %v662_v35 = vmul.f32 %v1121_v30, %v657_v31  ;;  %v665_v42 = vadd.f32 %v1115_v10, %v661_v37 }
 0x231   : > { %v660_v36 = vmul.f32 %v1123_v33, %v647_v26  ;;  %v663_v38 = vadd.f32 %v1109_v6, %v659_v32 }
 0x232   : > { %v666_v40 = vadd.f32 %v1111_v7, %v662_v35 }
 0x233   : > { %v664_v39 = vadd.f32 %v1113_v8, %v660_v36 }
 0x234   : > { %v672_v43 = vpack.c.bf16 %v666_v40, %v665_v42 }
 0x235   : > { %v671_v41 = vpack.c.bf16 %v664_v39, %v663_v38 }
 0x237   : > { %1024 = vmatprep.subr.bf16.mxu1 %v671_v41 }
 0x238   : > { %1025 = vmatpush3.bf16.msra.mxu1 %v671_v41 }
 0x239   : > { %1026 = vmatprep.subr.bf16.mxu1 %v672_v43 }
 0x23c   : > { %1027 = vmatpush3.bf16.msra.mxu1 %v672_v43 }
 0x23d   : > { %1043 = vmatprep.subr.bf16.mxu1 %v1197_v45 }
 0x23f   : > { %1029 = vmatmul.mubr.msk.bf16.vlgmr.msra.gmra.mrb[4].mxu1 %vm575_vm1, %v1107_v44 }
 0x240   : > { %1040 = vmatprep.mubr.msk.f32.mxu1 %vm1198_vm2, %v1199_v46 }
 0x312   : > { %v1030_v50 = vpop.f32.mrb[4].mxu1 }
 0x313   : > { %v756_v51 = vadd.f32 %v1030_v50, %v690_v49  ;;  %v747_v52 = vpop.f32.mrb[5].mxu1 }
 0x314   : > { %v748_v54 = vadd.f32 %v747_v52, %v680_v47  ;;  %v1031_v55 = vpop.f32.mrb[6].mxu1 }
 0x315   : > { %1124 = vtanh.f32 %v756_v51  ;;  %v759_v56 = vadd.f32 %v1031_v55, %v695_v53  ;;  %v750_v57 = vpop.f32.mrb[7].mxu1 }
 0x316   : > { %1126 = vtanh.f32 %v748_v54  ;;  %v751_v58 = vadd.f32 %v750_v57, %v685_v48 }
 0x317   : > { %1128 = vtanh.f32 %v759_v56 }
 0x318   : > { %1130 = vtanh.f32 %v751_v58 }
 0x31f   : > { %v1125_v61 = vpop.eup %1124 }
 0x320   : > { %v1127_v63 = vpop.eup %1126  ;;  %v792_v0 = vmul.f32 %v1125_v61, %v783_v62 }
 0x321   : > { %v1129_v1 = vpop.eup %1128  ;;  %v790_v3 = vmul.f32 %v1127_v63, %v773_v59 }
 0x322   : > { %v1131_v4 = vpop.eup %1130  ;;  %v793_v5 = vmul.f32 %v1129_v1, %v788_v2  ;;  %v796_v7 = vadd.f32 %v792_v0, %v665_v42 }
 0x323   : > { %v791_v6 = vmul.f32 %v1131_v4, %v778_v60  ;;  %v794_v9 = vadd.f32 %v790_v3, %v663_v38 }
 0x324   : > { %v797_v8 = vadd.f32 %v793_v5, %v666_v40 }
 0x325   : > { %v795_v10 = vadd.f32 %v791_v6, %v664_v39 }
 0x326   : > { %v1047_v11 = vpack.c.bf16 %v797_v8, %v796_v7 }
 0x327   : > { %v1044_v12 = vpack.c.bf16 %v795_v10, %v794_v9 }
 0x329   : > { %1045 = vmatpush3.bf16.msra.mxu1 %v1044_v12 }
 0x32a   : > { %1046 = vmatprep.subr.bf16.mxu1 %v1197_v45 }
 0x32d   : > { %1048 = vmatpush3.bf16.msra.mxu1 %v1047_v11 }
 0x330   : > { %1041 = vmatmul.mubr.msk.f32.vlgmr.msra.gmra.mrb[8].mxu1 %vm575_vm1, %v798_v13 }
 0x403   : > { %v878_v19 = vpop.f32.mrb[8].mxu1 }
 0x404   : > { %v879_v20 = vadd.f32 %v878_v19, %v808_v18  ;;  %v1042_v21 = vpop.f32.mrb[9].mxu1 }
 0x406   : > { %882 = vst [vmem:[%s381_s23] sm:$0x1] %v879_v20 }
 0x407   : > { %1145 = shalt.err (!%p1142_p3)
}
 0x408   : > { %s1146_s30 = scalar_lea.hbm %s1443_s12, 16  ;;  %s1150_s13 = scalar_lea.hbm %s1496_s11, 32 }
 0x409   : > { %p1147_p4 = scmp.ne.s32.totalorder %s1443_s12, %s1146_s30  ;;  %p1151_p9 = scmp.lt.u32.totalorder %s1443_s12, %s1496_s11 }
 0x40a   : > { %p1152_p10 = scmp.lt.u32.totalorder %s1150_s13, %s1146_s30  ;;  %p1154_p12 = scmp.lt.u32.totalorder %s1146_s30, %s1443_s12 }
 0x40b   : > { %p1148_p7 = pnand %p1147_p4, %p1299_p5 }
 0x40c   : > { %p1153_p11 = por %p1152_p10, %p1151_p9 }
 0x40d   : > { %p1149_p8 = pneg %p1148_p7 }
 0x40e   : > { %p1155_p13 = por %p1154_p12, %p1153_p11 }
 0x410   : > { %p1156_p0 = pnand %p1155_p13, %p1149_p8 }
 0x412   : > { %1159 = shalt.err (!%p1156_p0)
}
 0x413   : > { %1057 = dma.vmem_to_hbm [thread:$0]  (%p1299_p5), %s1445_s25, 16, %s1443_s12, %s884_s14  }
 0x414 PF: > { %p1063_p1 = scmp.ge.s32.totalorder %s1194_s22, 2  ;;  %s908_s15 = sand.u32 1, %s1182_s19  }
 0x415   : > { %s909_s17 = scalar_lea.sflag [#allocation4], %s908_s15 }
 0x416   : > { %p1060_p2 = pnand %p1063_p1, %p1303_p6 }
 0x418   : > { %1177 = dma.done.wait (!%p1060_p2), %s909_s17, 16  }
 0x419   : > { %1179 = vsyncadd (!%p1060_p2), %s909_s17, 4294967280  ;;  %p23_p3 = scmp.ge.s32.totalorder %s1287_s24, 4   ;;  %s1499_s19 = smov %s1186_s20 }
 0x41a   : > { %s1500_s20 = smov %s1190_s21  ;;  %s1501_s21 = smov %s1297_s27 }
 0x41b   : > { %s1502_s22 = smov %s1287_s24  ;;  %25 = sbr.rel (!%p23_p3) target bundleno = 6 (0x6), region = 99 }
 0x422   :  { %913 = vsyncpa [#allocation4], 1 }
 0x423   :  { %915 = vsyncpa [#allocation4 + $0x1], 1 }

</bundles_post_ra>
